<compile_context>
chip_gen: v5e
topology: v5e:2x2
jax: 0.10.0
libtpu: 0.0.40
codegen_flags: <defaults>
</compile_context>

<pallas_src>
import jax
import jax.numpy as jnp
from jax.experimental import pallas as pl
from jax.experimental.pallas import tpu as pltpu


# ---------------------------------------------------------------------------
# Kernel
# ---------------------------------------------------------------------------
def _kl_discret_kernel(px_ref, tx_ref, py_ref, ty_ref, w_ref, o_ref):
    """Per-row (sample, joint) weighted KL loss.

    px_ref/tx_ref: (tm, Wx)   py_ref/ty_ref: (tm, Wy)
    w_ref:         (tm, 1)    o_ref:         (tm, 1)  float32
    """

    def per_row_kl_mean(p_ref, t_ref):
        p = p_ref[...].astype(jnp.float32)
        t = t_ref[...].astype(jnp.float32)
        # log_softmax over the bin (lane) axis, numerically stable.
        m = jnp.max(p, axis=-1, keepdims=True)
        lse = jnp.log(jnp.sum(jnp.exp(p - m), axis=-1, keepdims=True)) + m
        logp = p - lse
        # KLDivLoss(reduction='none'): xlogy(t, t) - t * logp  (0 where t == 0).
        t_safe = jnp.where(t > 0, t, 1.0)
        elem = jnp.where(t > 0, t * jnp.log(t_safe), 0.0) - t * logp
        # mean over bins (lane reduction on the XLU).
        return jnp.mean(elem, axis=-1, keepdims=True)  # (tm, 1)

    rl = per_row_kl_mean(px_ref, tx_ref) + per_row_kl_mean(py_ref, ty_ref)
    o_ref[...] = (w_ref[...].astype(jnp.float32) * rl).astype(o_ref.dtype)


# ---------------------------------------------------------------------------
# Tile / VMEM budgeting
# ---------------------------------------------------------------------------
def _vmem_limit_bytes():
    cap = 64 * 1024 * 1024  # conservative default (v7x per-TensorCore VMEM)
    try:
        info = pltpu.get_tpu_info()
        cap = int(getattr(info, "vmem_capacity_bytes", cap))
    except Exception:
        pass
    # Leave ~25% headroom under physical capacity; never ask for more than 96 MiB.
    return min((cap * 3) // 4, 96 * 1024 * 1024)


def _choose_tm(m_rows, wx, wy, itemsize, vmem_limit_bytes):
    """Largest row tile (multiple of the sublane granularity) fitting the budget."""
    sub = 8 if itemsize >= 4 else (16 if itemsize == 2 else 32)
    if m_rows <= sub:
        return m_rows  # block equals full array dim -> always legal
    # Double-buffered bytes streamed per row across the 4 big inputs (+ weight).
    per_row = 2 * itemsize * (2 * wx + 2 * wy) + 2 * 4
    budget = vmem_limit_bytes // 2  # headroom for outputs / internal scratch
    tm = min(max(budget // max(per_row, 1), sub), 1024)
    tm = (tm // sub) * sub
    tm = min(tm, (m_rows // sub) * sub)
    return max(tm, sub)


# ---------------------------------------------------------------------------
# Wrapper: forward of KLDiscretLoss
# ---------------------------------------------------------------------------
def kl_discret_loss(output_x, output_y, target_x, target_y, target_weight):
    """Pallas implementation of KLDiscretLoss.forward.

    output_x/target_x: (B, K, Wx)   output_y/target_y: (B, K, Wy)
    target_weight:     (B, K) or (B, K, 1)
    Returns a scalar float32 loss.
    """
    B, K, Wx = output_x.shape
    Wy = output_y.shape[-1]
    M = B * K

    px = output_x.reshape(M, Wx)
    tx = target_x.reshape(M, Wx)
    py = output_y.reshape(M, Wy)
    ty = target_y.reshape(M, Wy)
    w = target_weight.reshape(M, 1).astype(jnp.float32)

    itemsize = max(
        jnp.dtype(output_x.dtype).itemsize, jnp.dtype(target_x.dtype).itemsize
    )
    vmem_limit = _vmem_limit_bytes()
    tm = _choose_tm(M, Wx, Wy, itemsize, vmem_limit)
    grid = (pl.cdiv(M, tm),)

    per_row = pl.pallas_call(
        _kl_discret_kernel,
        out_shape=jax.ShapeDtypeStruct((M, 1), jnp.float32),
        grid_spec=pltpu.PrefetchScalarGridSpec(
            num_scalar_prefetch=0,
            grid=grid,
            in_specs=[
                pl.BlockSpec((tm, Wx), lambda i: (i, 0)),
                pl.BlockSpec((tm, Wx), lambda i: (i, 0)),
                pl.BlockSpec((tm, Wy), lambda i: (i, 0)),
                pl.BlockSpec((tm, Wy), lambda i: (i, 0)),
                pl.BlockSpec((tm, 1), lambda i: (i, 0)),
            ],
            out_specs=pl.BlockSpec((tm, 1), lambda i: (i, 0)),
        ),
        compiler_params=pltpu.CompilerParams(
            dimension_semantics=("parallel",),
            vmem_limit_bytes=vmem_limit,
        ),
    )(px, tx, py, ty, w)

    # Tiny (B*K)-element reduction + normalization in plain JAX (negligible bytes,
    # keeps the kernel's grid axis fully parallel for v7x megacore sharding).
    return jnp.sum(per_row) / (B * K)


# ---------------------------------------------------------------------------
# Pure-JAX reference (mirrors the PyTorch module's intended forward)
# ---------------------------------------------------------------------------
def _reference(output_x, output_y, target_x, target_y, target_weight):
    def criterion(pred, tgt):
        logp = jax.nn.log_softmax(pred, axis=1)
        elem = jax.scipy.special.xlogy(tgt, tgt) - tgt * logp
        return jnp.mean(elem, axis=1)

    B, K, _ = output_x.shape
    tw = target_weight.reshape(B, K)
    loss = 0.0
    for idx in range(K):
        wgt = tw[:, idx]
        loss = loss + jnp.mean(criterion(output_x[:, idx], target_x[:, idx]) * wgt)
        loss = loss + jnp.mean(criterion(output_y[:, idx], target_y[:, idx]) * wgt)
    return loss / K


# ---------------------------------------------------------------------------
# Test
# ---------------------------------------------------------------------------
if __name__ == "__main__":
    key = jax.random.PRNGKey(0)
    B, K, Wx, Wy = 2, 4, 64, 48  # batch, joints, x-bins, y-bins (small SimCC-style)

    k1, k2, k3, k4, k5, k6, k7 = jax.random.split(key, 7)
    output_x = jax.random.normal(k1, (B, K, Wx), jnp.float32)
    output_y = jax.random.normal(k2, (B, K, Wy), jnp.float32)

    # Soft target distributions, with a few exact zeros to exercise xlogy(0,0)=0.
    target_x = jax.nn.softmax(2.0 * jax.random.normal(k3, (B, K, Wx), jnp.float32), -1)
    target_y = jax.nn.softmax(2.0 * jax.random.normal(k4, (B, K, Wy), jnp.float32), -1)
    target_x = jnp.where(jax.random.uniform(k5, (B, K, Wx)) < 0.1, 0.0, target_x)
    target_y = jnp.where(jax.random.uniform(k6, (B, K, Wy)) < 0.1, 0.0, target_y)

    target_weight = jax.random.uniform(k7, (B, K), jnp.float32)

    loss_fn = jax.jit(kl_discret_loss)
    loss = loss_fn(output_x, output_y, target_x, target_y, target_weight)
    jax.block_until_ready(loss)

    ref = _reference(output_x, output_y, target_x, target_y, target_weight)
    assert jnp.allclose(loss, ref, atol=1e-5, rtol=1e-5), (float(loss), float(ref))

    print("KERNEL_OK")
</pallas_src>

<mosaic_0001>
module attributes {stable_mosaic.version = 11 : i64} {
  func.func @_kl_discret_kernel(%arg0: i32, %arg1: memref<8x64xf32, #tpu.memory_space<vmem>>, %arg2: memref<8x64xf32, #tpu.memory_space<vmem>>, %arg3: memref<8x48xf32, #tpu.memory_space<vmem>>, %arg4: memref<8x48xf32, #tpu.memory_space<vmem>>, %arg5: memref<8x1xf32, #tpu.memory_space<vmem>>, %arg6: memref<8x1xf32, #tpu.memory_space<vmem>>) attributes {dimension_semantics = [#tpu.dimension_semantics<parallel>], iteration_bounds = array<i64: 1>, scalar_prefetch = 0 : i64, scratch_operands = 0 : i64, tpu.core_type = #tpu.core_type<tc>, window_params = [{transform_indices = @transform_0, window_bounds = array<i64: 8, 64>}, {transform_indices = @transform_1, window_bounds = array<i64: 8, 64>}, {transform_indices = @transform_2, window_bounds = array<i64: 8, 48>}, {transform_indices = @transform_3, window_bounds = array<i64: 8, 48>}, {transform_indices = @transform_4, window_bounds = array<i64: 8, 1>}, {transform_indices = @transform_5, window_bounds = array<i64: 8, 1>}]} {
    %c0 = arith.constant 0 : index
    %c0_0 = arith.constant 0 : index
    %0 = vector.load %arg1[%c0, %c0_0] : memref<8x64xf32, #tpu.memory_space<vmem>>, vector<8x64xf32>
    %c0_1 = arith.constant 0 : index
    %c0_2 = arith.constant 0 : index
    %1 = vector.load %arg2[%c0_1, %c0_2] : memref<8x64xf32, #tpu.memory_space<vmem>>, vector<8x64xf32>
    %cst = arith.constant dense<0xFF800000> : vector<8xf32>
    %2 = vector.multi_reduction <maximumf>, %0, %cst [1] : vector<8x64xf32> to vector<8xf32>
    %3 = vector.shape_cast %2 : vector<8xf32> to vector<8x1xf32>
    %4 = vector.broadcast %3 : vector<8x1xf32> to vector<8x64xf32>
    %5 = arith.subf %0, %4 : vector<8x64xf32>
    %6 = math.exp %5 : vector<8x64xf32>
    %cst_3 = arith.constant dense<0.000000e+00> : vector<8xf32>
    %7 = vector.multi_reduction <add>, %6, %cst_3 [1] : vector<8x64xf32> to vector<8xf32>
    %8 = vector.shape_cast %7 : vector<8xf32> to vector<8x1xf32>
    %9 = math.log %8 : vector<8x1xf32>
    %10 = arith.addf %9, %3 : vector<8x1xf32>
    %11 = vector.broadcast %10 : vector<8x1xf32> to vector<8x64xf32>
    %12 = arith.subf %0, %11 : vector<8x64xf32>
    %cst_4 = arith.constant 0.000000e+00 : f32
    %13 = vector.broadcast %cst_4 : f32 to vector<8x64xf32>
    %14 = arith.cmpf ogt, %1, %13 : vector<8x64xf32>
    %cst_5 = arith.constant 1.000000e+00 : f32
    %15 = vector.broadcast %cst_5 : f32 to vector<8x64xf32>
    %16 = arith.select %14, %1, %15 : vector<8x64xi1>, vector<8x64xf32>
    %cst_6 = arith.constant 0.000000e+00 : f32
    %17 = vector.broadcast %cst_6 : f32 to vector<8x64xf32>
    %18 = arith.cmpf ogt, %1, %17 : vector<8x64xf32>
    %19 = math.log %16 : vector<8x64xf32>
    %20 = arith.mulf %1, %19 : vector<8x64xf32>
    %cst_7 = arith.constant 0.000000e+00 : f32
    %21 = vector.broadcast %cst_7 : f32 to vector<8x64xf32>
    %22 = arith.select %18, %20, %21 : vector<8x64xi1>, vector<8x64xf32>
    %23 = arith.mulf %1, %12 : vector<8x64xf32>
    %24 = arith.subf %22, %23 : vector<8x64xf32>
    %cst_8 = arith.constant dense<0.000000e+00> : vector<8xf32>
    %25 = vector.multi_reduction <add>, %24, %cst_8 [1] : vector<8x64xf32> to vector<8xf32>
    %26 = vector.shape_cast %25 : vector<8xf32> to vector<8x1xf32>
    %cst_9 = arith.constant 6.400000e+01 : f32
    %27 = vector.broadcast %cst_9 : f32 to vector<8x1xf32>
    %28 = arith.divf %26, %27 : vector<8x1xf32>
    %c0_10 = arith.constant 0 : index
    %c0_11 = arith.constant 0 : index
    %29 = vector.load %arg3[%c0_10, %c0_11] : memref<8x48xf32, #tpu.memory_space<vmem>>, vector<8x48xf32>
    %c0_12 = arith.constant 0 : index
    %c0_13 = arith.constant 0 : index
    %30 = vector.load %arg4[%c0_12, %c0_13] : memref<8x48xf32, #tpu.memory_space<vmem>>, vector<8x48xf32>
    %cst_14 = arith.constant dense<0xFF800000> : vector<8xf32>
    %31 = vector.multi_reduction <maximumf>, %29, %cst_14 [1] : vector<8x48xf32> to vector<8xf32>
    %32 = vector.shape_cast %31 : vector<8xf32> to vector<8x1xf32>
    %33 = vector.broadcast %32 : vector<8x1xf32> to vector<8x48xf32>
    %34 = arith.subf %29, %33 : vector<8x48xf32>
    %35 = math.exp %34 : vector<8x48xf32>
    %cst_15 = arith.constant dense<0.000000e+00> : vector<8xf32>
    %36 = vector.multi_reduction <add>, %35, %cst_15 [1] : vector<8x48xf32> to vector<8xf32>
    %37 = vector.shape_cast %36 : vector<8xf32> to vector<8x1xf32>
    %38 = math.log %37 : vector<8x1xf32>
    %39 = arith.addf %38, %32 : vector<8x1xf32>
    %40 = vector.broadcast %39 : vector<8x1xf32> to vector<8x48xf32>
    %41 = arith.subf %29, %40 : vector<8x48xf32>
    %cst_16 = arith.constant 0.000000e+00 : f32
    %42 = vector.broadcast %cst_16 : f32 to vector<8x48xf32>
    %43 = arith.cmpf ogt, %30, %42 : vector<8x48xf32>
    %cst_17 = arith.constant 1.000000e+00 : f32
    %44 = vector.broadcast %cst_17 : f32 to vector<8x48xf32>
    %45 = arith.select %43, %30, %44 : vector<8x48xi1>, vector<8x48xf32>
    %cst_18 = arith.constant 0.000000e+00 : f32
    %46 = vector.broadcast %cst_18 : f32 to vector<8x48xf32>
    %47 = arith.cmpf ogt, %30, %46 : vector<8x48xf32>
    %48 = math.log %45 : vector<8x48xf32>
    %49 = arith.mulf %30, %48 : vector<8x48xf32>
    %cst_19 = arith.constant 0.000000e+00 : f32
    %50 = vector.broadcast %cst_19 : f32 to vector<8x48xf32>
    %51 = arith.select %47, %49, %50 : vector<8x48xi1>, vector<8x48xf32>
    %52 = arith.mulf %30, %41 : vector<8x48xf32>
    %53 = arith.subf %51, %52 : vector<8x48xf32>
    %cst_20 = arith.constant dense<0.000000e+00> : vector<8xf32>
    %54 = vector.multi_reduction <add>, %53, %cst_20 [1] : vector<8x48xf32> to vector<8xf32>
    %55 = vector.shape_cast %54 : vector<8xf32> to vector<8x1xf32>
    %cst_21 = arith.constant 4.800000e+01 : f32
    %56 = vector.broadcast %cst_21 : f32 to vector<8x1xf32>
    %57 = arith.divf %55, %56 : vector<8x1xf32>
    %58 = arith.addf %28, %57 : vector<8x1xf32>
    %c0_22 = arith.constant 0 : index
    %c0_23 = arith.constant 0 : index
    %59 = vector.load %arg5[%c0_22, %c0_23] : memref<8x1xf32, #tpu.memory_space<vmem>>, vector<8x1xf32>
    %60 = arith.mulf %59, %58 : vector<8x1xf32>
    %c0_24 = arith.constant 0 : index
    %c0_25 = arith.constant 0 : index
    %61 = vector.load %arg6[%c0_24, %c0_25] : memref<8x1xf32, #tpu.memory_space<vmem>>, vector<8x1xf32>
    tpu.vector_store %arg6[%c0_24, %c0_25], %60 {strides = array<i32>} : memref<8x1xf32, #tpu.memory_space<vmem>>, vector<8x1xf32>,
    return
  }
  func.func @transform_0(%arg0: i32) -> (i32, i32) {
    %c0_i32 = arith.constant 0 : i32
    %c0_i32_0 = arith.constant 0 : i32
    return %arg0, %c0_i32 : i32, i32
  }
  func.func @transform_1(%arg0: i32) -> (i32, i32) {
    %c0_i32 = arith.constant 0 : i32
    %c0_i32_0 = arith.constant 0 : i32
    return %arg0, %c0_i32 : i32, i32
  }
  func.func @transform_2(%arg0: i32) -> (i32, i32) {
    %c0_i32 = arith.constant 0 : i32
    %c0_i32_0 = arith.constant 0 : i32
    return %arg0, %c0_i32 : i32, i32
  }
  func.func @transform_3(%arg0: i32) -> (i32, i32) {
    %c0_i32 = arith.constant 0 : i32
    %c0_i32_0 = arith.constant 0 : i32
    return %arg0, %c0_i32 : i32, i32
  }
  func.func @transform_4(%arg0: i32) -> (i32, i32) {
    %c0_i32 = arith.constant 0 : i32
    %c0_i32_0 = arith.constant 0 : i32
    return %arg0, %c0_i32 : i32, i32
  }
  func.func @transform_5(%arg0: i32) -> (i32, i32) {
    %c0_i32 = arith.constant 0 : i32
    %c0_i32_0 = arith.constant 0 : i32
    return %arg0, %c0_i32 : i32, i32
  }
}

</mosaic_0001>

<bundles_post_ra>
// kernel: kl_discret_loss.1
= control target key start
LH: loop header
LB: loop body
LE: loop exit
PB: predicated region body
PF: predicated region fallthrough
CT: control target
= control target key end

     0   :  { %10 = vsyncpa [#allocation3], 0  ;;  %s302_s0 = inlined_call_operand.vmem [shape: f32[8,64], index: 0, kind: input, shape index: {}]   ;;  %s303_s1 = inlined_call_operand.hbm [shape: f32[8,64], index: 1, kind: input, shape index: {}]   ;;  %s304_s2 = inlined_call_operand.hbm [shape: f32[8,48], index: 2, kind: input, shape index: {}]   ;;  %s305_s3 = inlined_call_operand.hbm [shape: f32[8,48], index: 3, kind: input, shape index: {}]   ;;  %s306_s4 = inlined_call_operand.vmem [shape: f32[8,1], index: 4, kind: input, shape index: {}]   ;;  %s307_s5 = inlined_call_operand.vmem [shape: f32[8,1], index: 5, kind: output, shape index: {}]  }
   0x1   :  { %11 = vsyncpa [#allocation5], 0  ;;  %s30_s20 = sshll.u32 %s304_s2, 4  ;;  %s239_s21 = smov [#allocation4]   ;;  %s31_s20 = int_to_ptr.hbm [resolvable:$true] %s30_s20 }
   0x2   :  { %s32_s22 = sshll.u32 %s239_s21, 4  ;;  %s19_s25 = sshll.u32 %s303_s1, 4  ;;  %s33_s22 = int_to_ptr.vmem [resolvable:$true] %s32_s22  ;;  %s20_s25 = int_to_ptr.hbm [resolvable:$true] %s19_s25 }
   0x3   :  { %35 = dma.hbm_to_vmem [thread:$0]  %s31_s20, 128, %s33_s22, [#allocation5]  }
   0x4   :  { %s240_s26 = smov [#allocation2]   ;;  %s41_s30 = sshll.u32 %s305_s3, 4  ;;  %s42_s30 = int_to_ptr.hbm [resolvable:$true] %s41_s30 }
   0x5   :  { %s21_s27 = sshll.u32 %s240_s26, 4  ;;  %s241_s2 = smov [#allocation6]   ;;  %s22_s27 = int_to_ptr.vmem [resolvable:$true] %s21_s27 }
   0x6   :  { %24 = dma.hbm_to_vmem [thread:$0]  %s20_s25, 128, %s22_s27, [#allocation3]  }
   0x7   :  { %s43_s6 = sshll.u32 %s241_s2, 4  ;;  %s44_s6 = int_to_ptr.vmem [resolvable:$true] %s43_s6 }
   0x8   :  { %46 = dma.hbm_to_vmem [thread:$0]  %s42_s30, 128, %s44_s6, [#allocation5]  }
   0x9   :  { %235 = dma.done.wait [#allocation3], 128  }
   0xa   :  { %236 = vsyncadd [#allocation3], 4294967168 }
   0xb   :  { %237 = dma.done.wait [#allocation5], 256  }
   0xc   :  { %238 = vsyncadd [#allocation5], 4294967040  ;;  %vm63_vm0 = vcmask 523264   ;;  %v61_v0 = vld [vmem:[%s302_s0] sm:$0xff]  ;;  %v96_v2 = vld [vmem:[#allocation4] sm:$0xff]  ;;  %vm98_vm1 = vcmask 392192  }
   0xd   :  { %v64_v1 = vsel %vm63_vm0, %v61_v0, -inf  ;;  %v99_v3 = vsel %vm98_vm1, %v96_v2, -inf  ;;  %v62_v14 = vld [vmem:[#allocation2] sm:$0xff]  ;;  %v97_v16 = vld [vmem:[#allocation6] sm:$0xff]  ;;  %v242_v42 = vmov 64.0   ;;  %v243_v43 = vmov 48.0  }
   0xe   :  { %65 = vmax.xlane.f32.xlu0 %v64_v1  ;;  %vm77_vm2 = vcmp.gt.f32.partialorder %v62_v14, 0.0  ;;  %vm112_vm3 = vcmp.gt.f32.partialorder %v97_v16, 0.0  ;;  %v132_v60 = vld [vmem:[%s306_s4] sm:$0xff]  ;;  %vm134_vm6 = vcmask 7168  }
   0xf   :  { %v78_v15 = vsel %vm77_vm2, %v62_v14, 1.0  ;;  %v113_v18 = vsel %vm112_vm3, %v97_v16, 1.0 }
  0x16   :  { %100 = vmax.xlane.f32.xlu0 %v99_v3 }
  0x81   :  { %v66_v4 = vpop.xlane.xlu0 %65 }
  0x82   :  { %v67_v5 = vsub.f32 %v61_v0, %v66_v4 }
  0x84   :  { %v68_v6 = vmul.f32 1.442695, %v67_v5 }
  0x86   :  { %147 = vpow2.f32 %v68_v6 }
  0x89   :  { %v101_v7 = vpop.xlane.xlu0 %100 }
  0x8a   :  { %v102_v8 = vsub.f32 %v96_v2, %v101_v7 }
  0x8c   :  { %v148_v9 = vpop.eup %147  ;;  %v103_v10 = vmul.f32 1.442695, %v102_v8 }
  0x8d   :  { %v70_v11 = vsel %vm63_vm0, %v148_v9, 0.0 }
  0x8e   :  { %149 = vpow2.f32 %v103_v10  ;;  %71 = vadd.xlane.f32.xlu1 %v70_v11 }
  0x8f   :  { %151 = vlog2.f32 %v78_v15 }
  0x94   :  { %v150_v12 = vpop.eup %149 }
  0x95   :  { %v105_v13 = vsel %vm98_vm1, %v150_v12, 0.0  ;;  %v152_v19 = vpop.eup %151 }
  0x96   :  { %106 = vadd.xlane.f32.xlu1 %v105_v13  ;;  %v80_v20 = vmul.f32 0.6931472, %v152_v19 }
  0x98   :  { %v81_v24 = vmul.f32 %v80_v20, %v62_v14 }
  0x9a   :  { %v82_v28 = vsel %vm77_vm2, %v81_v24, 0.0 }
 0x101   :  { %v72_v17 = vpop.xlane.xlu1 %71 }
 0x102   :  { %153 = vlog2.f32 %v72_v17 }
 0x103   :  { %155 = vlog2.f32 %v113_v18 }
 0x108   :  { %v154_v21 = vpop.eup %153 }
 0x109   :  { %v74_v22 = vmul.f32 0.6931472, %v154_v21  ;;  %v107_v23 = vpop.xlane.xlu1 %106  ;;  %v156_v25 = vpop.eup %155 }
 0x10a   :  { %157 = vlog2.f32 %v107_v23  ;;  %v115_v29 = vmul.f32 0.6931472, %v156_v25 }
 0x10b   :  { %v75_v26 = vadd.f32 %v74_v22, %v66_v4  ;;  %159 = vrcp.f32 %v242_v42 }
 0x10c   :  { %v116_v34 = vmul.f32 %v115_v29, %v97_v16  ;;  %161 = vrcp.f32 %v243_v43 }
 0x10d   :  { %v76_v27 = vsub.f32 %v61_v0, %v75_v26 }
 0x10e   :  { %v117_v38 = vsel %vm112_vm3, %v116_v34, 0.0 }
 0x10f   :  { %v83_v30 = vmul.f32 %v76_v27, %v62_v14 }
 0x110   :  { %v158_v31 = vpop.eup %157 }
 0x111   :  { %v109_v32 = vmul.f32 0.6931472, %v158_v31  ;;  %v84_v33 = vsub.f32 %v82_v28, %v83_v30  ;;  %v160_v44 = vpop.eup %159 }
 0x112   :  { %v162_v45 = vpop.eup %161  ;;  %v89_v46 = vmul.f32 64.0, %v160_v44  ;;  %vm93_vm4 = vweird.f32 %v160_v44 }
 0x113   :  { %v110_v35 = vadd.f32 %v109_v32, %v101_v7  ;;  %v85_v36 = vsel %vm63_vm0, %v84_v33, 0.0  ;;  %v124_v47 = vmul.f32 48.0, %v162_v45  ;;  %vm128_vm5 = vweird.f32 %v162_v45 }
 0x114   :  { %86 = vadd.xlane.f32.xlu2 %v85_v36  ;;  %v90_v48 = vsub.f32 1.0, %v89_v46 }
 0x115   :  { %v111_v37 = vsub.f32 %v96_v2, %v110_v35  ;;  %v125_v49 = vsub.f32 1.0, %v124_v47 }
 0x116   :  { %v91_v50 = vmul.f32 %v160_v44, %v90_v48 }
 0x117   :  { %v118_v39 = vmul.f32 %v111_v37, %v97_v16  ;;  %v126_v51 = vmul.f32 %v162_v45, %v125_v49 }
 0x118   :  { %v92_v53 = vadd.f32 %v160_v44, %v91_v50 }
 0x119   :  { %v119_v40 = vsub.f32 %v117_v38, %v118_v39  ;;  %v127_v54 = vadd.f32 %v162_v45, %v126_v51 }
 0x11a   :  { %v94_v55 = vsel %vm93_vm4, %v160_v44, %v92_v53 }
 0x11b   :  { %v120_v41 = vsel %vm98_vm1, %v119_v40, 0.0  ;;  %v129_v56 = vsel %vm128_vm5, %v162_v45, %v127_v54 }
 0x11c   :  { %121 = vadd.xlane.f32.xlu2 %v120_v41 }
 0x187   :  { %v87_v52 = vpop.xlane.xlu2 %86 }
 0x188   :  { %v95_v58 = vmul.f32 %v94_v55, %v87_v52 }
 0x18f   :  { %v122_v57 = vpop.xlane.xlu2 %121 }
 0x190   :  { %v130_v59 = vmul.f32 %v129_v56, %v122_v57 }
 0x192   :  { %v131_v61 = vadd.f32 %v130_v59, %v95_v58 }
 0x194   :  { %v133_v62 = vmul.f32 %v132_v60, %v131_v61 }
 0x196   :  { %135 = vst.msk [vmem:[%s307_s5] sm:$0xff] %vm134_vm6, %v133_v62 }
 0x197   :  { %140 = vsyncpa [#allocation3], 1 }
 0x198   :  { %141 = vsyncpa [#allocation5], 1 }

</bundles_post_ra>
